<compile_context>
chip_gen: v6e
topology: v6e:2x2x1
jax: 0.10.0
libtpu: 0.0.40
codegen_flags: <defaults>
</compile_context>

<pallas_src>
import jax
import jax.numpy as jnp
from jax.experimental import pallas as pl
from jax.experimental.pallas import tpu as pltpu


def _channel_mix_kernel(x_ref, wt_ref, b_ref, out_ref, part_ref):
    # x_ref:    (Bt, C, tile_s)    NCHW slab, spatial on lanes
    # wt_ref:   (C, C)             W^T, VMEM resident across the grid
    # b_ref:    (C, 1)             bias, broadcast over lanes
    # out_ref:  (Bt, C, tile_s)    NCHW output slab (lane-dense store)
    # part_ref: (1, 1, 1, tile_s)  per-lane partial sums of out**2 (lane-dense)
    wt = wt_ref[...]
    bias = b_ref[...]
    bt = x_ref.shape[0]

    sq_acc = None
    for bi in range(bt):  # bt is a small static constant (<= 8), unrolled
        y = jnp.dot(wt, x_ref[bi], preferred_element_type=jnp.float32)
        y = y + bias                                   # (C, tile_s), lane-broadcast
        out_ref[bi] = y.astype(out_ref.dtype)
        sq = y * y
        sq_acc = sq if sq_acc is None else sq_acc + sq

    # Reduce only over channels (cheap sublane reduce); lanes stay dense so
    # the partial-loss store is an unmasked, 128-aligned vst.
    part_ref[...] = jnp.sum(sq_acc, axis=0, keepdims=True)[None, None]


def _largest_tile(spatial, cap_lanes):
    """Largest divisor of `spatial` that is a multiple of 128 and <= cap_lanes."""
    n = spatial // 128
    best = 1
    for d in range(1, n + 1):
        if n % d == 0 and d * 128 <= cap_lanes:
            best = d
    return best * 128


def permute_to_from(x_nchw, w, b, *,
                    target_block_bytes=2 * 1024 * 1024,
                    max_batch_fold=8):
    """Equivalent of PermuteToFrom(fn)(x) with fn = linear channel mix + aux loss.

    Computes out[b, c, h, w] = sum_k W[k, c] * x[b, k, h, w] + b[c]
    (i.e. the NHWC linear layer, expressed directly on NCHW) and
    loss = mean(out ** 2).

    Args:
      x_nchw: (B, C, H, W) float32
      w:      (C, C)       float32
      b:      (C,)         float32
    Returns:
      (out_nchw, loss) with out_nchw of shape (B, C, H, W), loss scalar.
    """
    B, C, H, W = x_nchw.shape
    S = H * W
    assert C % 8 == 0, "channels must be a multiple of 8 (sublane)"
    assert S % 128 == 0, "H*W must be a multiple of 128 (lane)"

    itemsize = jnp.dtype(x_nchw.dtype).itemsize

    # --- spatial tile sized by bytes (~target_block_bytes per slab) ---------
    cap_lanes = max(128, (target_block_bytes // (C * itemsize)) // 128 * 128)
    tile_s = _largest_tile(S, cap_lanes)
    ns = S // tile_s

    # --- batch folding when the whole spatial plane is one small block -----
    Bt = 1
    if ns == 1:
        slab_bytes = C * S * itemsize
        fold_cap = max(1, min(max_batch_fold, target_block_bytes // slab_bytes))
        if B >= 2:
            # keep at least 2 grid steps so both v7x TensorCores get work
            fold_cap = min(fold_cap, max(1, B // 2))
        for d in range(1, B + 1):
            if B % d == 0 and d <= fold_cap:
                Bt = d
    nb = B // Bt

    # --- v7x grid balance: if the grid collapsed to one step, split spatial -
    if nb * ns == 1 and S // 128 >= 2:
        tile_s = _largest_tile(S, S // 2)
        ns = S // tile_s

    x3 = x_nchw.reshape(B, C, S)        # free reshape (stays NCHW-contiguous)
    wt = w.T                            # (C, C), tiny
    b2 = b.reshape(C, 1)

    out3, partials = pl.pallas_call(
        _channel_mix_kernel,
        out_shape=(
            jax.ShapeDtypeStruct((B, C, S), x_nchw.dtype),
            jax.ShapeDtypeStruct((nb, ns, 1, tile_s), jnp.float32),
        ),
        grid_spec=pltpu.PrefetchScalarGridSpec(
            num_scalar_prefetch=0,
            grid=(nb, ns),
            in_specs=[
                pl.BlockSpec((Bt, C, tile_s), lambda bi, si: (bi, 0, si)),  # x slab
                pl.BlockSpec((C, C), lambda bi, si: (0, 0)),                # W^T (resident)
                pl.BlockSpec((C, 1), lambda bi, si: (0, 0)),                # bias (resident)
                # (pipeline_mode=pl.Buffered(1) on the two resident operands
                #  would save one redundant buffer; negligible at these C.)
            ],
            out_specs=[
                pl.BlockSpec((Bt, C, tile_s), lambda bi, si: (bi, 0, si)),   # out slab
                pl.BlockSpec((1, 1, 1, tile_s), lambda bi, si: (bi, si, 0, 0)),  # loss part
            ],
        ),
        compiler_params=pltpu.CompilerParams(
            dimension_semantics=("parallel", "parallel"),
            vmem_limit_bytes=32 * 1024 * 1024,
        ),
    )(x3, wt, b2)

    out_nchw = out3.reshape(B, C, H, W)  # free reshape
    loss = jnp.sum(partials) / jnp.float32(B * C * S)
    return out_nchw, loss


if __name__ == "__main__":
    B, C, H, W = 2, 32, 16, 16
    key = jax.random.PRNGKey(0)
    kx, kw, kb = jax.random.split(key, 3)
    x = jax.random.normal(kx, (B, C, H, W), dtype=jnp.float32)
    w = jax.random.normal(kw, (C, C), dtype=jnp.float32) * 0.1
    b = jax.random.normal(kb, (C,), dtype=jnp.float32) * 0.01

    out, loss = jax.jit(permute_to_from)(x, w, b)
    jax.block_until_ready((out, loss))

    # reference check (pure JAX, follows the PyTorch module's permute dance)
    x_nhwc = jnp.transpose(x, (0, 2, 3, 1))
    ref_nhwc = x_nhwc @ w + b
    ref_out = jnp.transpose(ref_nhwc, (0, 3, 1, 2))
    ref_loss = jnp.mean(ref_nhwc ** 2)
    assert out.shape == (B, C, H, W)
    assert jnp.allclose(out, ref_out, atol=1e-4, rtol=1e-4)
    assert jnp.allclose(loss, ref_loss, atol=1e-4, rtol=1e-4)

    print("KERNEL_OK")
</pallas_src>

<mosaic_0001>
module attributes {stable_mosaic.version = 11 : i64} {
  func.func @_channel_mix_kernel(%arg0: i32, %arg1: i32, %arg2: memref<1x32x256xf32, #tpu.memory_space<vmem>>, %arg3: memref<32x32xf32, #tpu.memory_space<vmem>>, %arg4: memref<32x1xf32, #tpu.memory_space<vmem>>, %arg5: memref<1x32x256xf32, #tpu.memory_space<vmem>>, %arg6: memref<1x1x1x256xf32, #tpu.memory_space<vmem>>) attributes {dimension_semantics = [#tpu.dimension_semantics<parallel>, #tpu.dimension_semantics<parallel>], iteration_bounds = array<i64: 2, 1>, scalar_prefetch = 0 : i64, scratch_operands = 0 : i64, tpu.core_type = #tpu.core_type<tc>, window_params = [{transform_indices = @transform_0, window_bounds = array<i64: 1, 32, 256>}, {pipeline_mode = #tpu.pipeline_mode<synchronous>, transform_indices = @transform_1, window_bounds = array<i64: 32, 32>}, {pipeline_mode = #tpu.pipeline_mode<synchronous>, transform_indices = @transform_2, window_bounds = array<i64: 32, 1>}, {transform_indices = @transform_3, window_bounds = array<i64: 1, 32, 256>}, {transform_indices = @transform_4, window_bounds = array<i64: 1, 1, 1, 256>}]} {
    %c0 = arith.constant 0 : index
    %c0_0 = arith.constant 0 : index
    %0 = vector.load %arg3[%c0, %c0_0] : memref<32x32xf32, #tpu.memory_space<vmem>>, vector<32x32xf32>
    %c0_1 = arith.constant 0 : index
    %c0_2 = arith.constant 0 : index
    %1 = vector.load %arg4[%c0_1, %c0_2] : memref<32x1xf32, #tpu.memory_space<vmem>>, vector<32x1xf32>
    %c0_3 = arith.constant 0 : index
    %c0_4 = arith.constant 0 : index
    %c0_5 = arith.constant 0 : index
    %2 = vector.load %arg2[%c0_3, %c0_4, %c0_5] : memref<1x32x256xf32, #tpu.memory_space<vmem>>, vector<1x32x256xf32>
    %3 = vector.shape_cast %2 : vector<1x32x256xf32> to vector<32x256xf32>
    %cst = arith.constant dense<0.000000e+00> : vector<32x256xf32>
    %4 = tpu.matmul %0, %3, %cst {dimension_numbers = #tpu.dot_dimension_numbers<[1], [0], [0], [1], [0, 0, 1, 1], [], []>} : vector<32x32xf32>, vector<32x256xf32>, vector<32x256xf32> -> vector<32x256xf32>
    %5 = vector.broadcast %1 : vector<32x1xf32> to vector<32x256xf32>
    %6 = arith.addf %4, %5 : vector<32x256xf32>
    %c0_6 = arith.constant 0 : index
    %c0_7 = arith.constant 0 : index
    %c0_8 = arith.constant 0 : index
    %7 = vector.load %arg5[%c0_6, %c0_7, %c0_8] : memref<1x32x256xf32, #tpu.memory_space<vmem>>, vector<1x32x256xf32>
    %8 = vector.shape_cast %7 : vector<1x32x256xf32> to vector<32x256xf32>
    %9 = vector.shape_cast %6 : vector<32x256xf32> to vector<1x32x256xf32>
    tpu.vector_store %arg5[%c0_6, %c0_7, %c0_8], %9 {strides = array<i32>} : memref<1x32x256xf32, #tpu.memory_space<vmem>>, vector<1x32x256xf32>,
    %10 = arith.mulf %6, %6 : vector<32x256xf32>
    %cst_9 = arith.constant dense<0.000000e+00> : vector<256xf32>
    %11 = vector.multi_reduction <add>, %10, %cst_9 [0] : vector<32x256xf32> to vector<256xf32>
    %12 = vector.shape_cast %11 : vector<256xf32> to vector<1x256xf32>
    %13 = vector.shape_cast %12 : vector<1x256xf32> to vector<1x1x1x256xf32>
    %c0_10 = arith.constant 0 : index
    %c0_11 = arith.constant 0 : index
    %c0_12 = arith.constant 0 : index
    %c0_13 = arith.constant 0 : index
    %14 = vector.load %arg6[%c0_10, %c0_11, %c0_12, %c0_13] : memref<1x1x1x256xf32, #tpu.memory_space<vmem>>, vector<1x1x1x256xf32>
    tpu.vector_store %arg6[%c0_10, %c0_11, %c0_12, %c0_13], %13 {strides = array<i32>} : memref<1x1x1x256xf32, #tpu.memory_space<vmem>>, vector<1x1x1x256xf32>,
    return
  }
  func.func @transform_0(%arg0: i32, %arg1: i32) -> (i32, i32, i32) {
    %c0_i32 = arith.constant 0 : i32
    %c0_i32_0 = arith.constant 0 : i32
    return %arg0, %c0_i32, %arg1 : i32, i32, i32
  }
  func.func @transform_1(%arg0: i32, %arg1: i32) -> (i32, i32) {
    %c0_i32 = arith.constant 0 : i32
    %c0_i32_0 = arith.constant 0 : i32
    %c0_i32_1 = arith.constant 0 : i32
    return %c0_i32, %c0_i32_0 : i32, i32
  }
  func.func @transform_2(%arg0: i32, %arg1: i32) -> (i32, i32) {
    %c0_i32 = arith.constant 0 : i32
    %c0_i32_0 = arith.constant 0 : i32
    %c0_i32_1 = arith.constant 0 : i32
    return %c0_i32, %c0_i32_0 : i32, i32
  }
  func.func @transform_3(%arg0: i32, %arg1: i32) -> (i32, i32, i32) {
    %c0_i32 = arith.constant 0 : i32
    %c0_i32_0 = arith.constant 0 : i32
    return %arg0, %c0_i32, %arg1 : i32, i32, i32
  }
  func.func @transform_4(%arg0: i32, %arg1: i32) -> (i32, i32, i32, i32) {
    %c0_i32 = arith.constant 0 : i32
    %c0_i32_0 = arith.constant 0 : i32
    %c0_i32_1 = arith.constant 0 : i32
    return %arg0, %arg1, %c0_i32, %c0_i32_0 : i32, i32, i32, i32
  }
}

</mosaic_0001>

<bundles_post_ra>
// kernel: permute_to_from.1
= control target key start
LH: loop header
LB: loop body
LE: loop exit
PB: predicated region body
PF: predicated region fallthrough
CT: control target
= control target key end

     0   :  { %s694_s15 = smov 0   ;;  %s696_s16 = smov 0   ;;  %s776_s0 = inlined_call_operand.vmem [shape: f32[2,32,256], index: 0, kind: input, shape index: {}]   ;;  %s777_s1 = inlined_call_operand.vmem [shape: f32[32,32], index: 1, kind: input, shape index: {}]   ;;  %s778_s2 = inlined_call_operand.vmem [shape: f32[32,1], index: 2, kind: input, shape index: {}]   ;;  %s779_s3 = inlined_call_operand.vmem [shape: f32[2,32,256], index: 3, kind: output, shape index: {0}]   ;;  %s780_s4 = inlined_call_operand.vmem [shape: f32[2,1,1,256], index: 4, kind: output, shape index: {1}]  }
   0x1   :  { %s698_s17 = smov 0  }
   0x2 LB: > { %s27_s18 = sadd.s32 1, %s660_s16  ;;  %p591_p0 = scmp.ge.s32.totalorder %s664_s17, 1  ;;  %s664_s17 = sphi %s698_s17, %s15_s17   ;;  %s660_s16 = sphi %s696_s16, %s782_s16   ;;  %s656_s15 = sphi %s694_s15, %s781_s15  }
   0x3   : > { %p29_p1 = scmp.ge.s32.totalorder %s27_s18, 2  ;;  %p188_p2 = scmp.lt.s32.totalorder %s664_s17, 3 }
   0x5   : > { %s784_s18 = smov (%p29_p1, %s27_s18), 0  ;;  %p189_p3 = pnand %p591_p0, %p188_p2 }
   0x6   : > { %p231_p4 = scmp.lt.s32.totalorder (!%p189_p3), %s656_s15, 1 }
   0x7   : > { %192 = sbr.rel (%p189_p3) target bundleno = 252 (0xfc), region = 32 }
   0xc   : > { %v666_v0 = vmov 0.0   ;;  %v262_v1 = vld [vmem:[%s778_s2] sm:$0xff]  ;;  %v264_v2 = vld [vmem:[%s778_s2 + $0x10] sm:$0xff]  ;;  %s786_s15 = smov (!%p231_p4, %s656_s15), 1  ;;  %v667_v3 = vmov 0   ;;  %vm294_vm0 = vcmask 261120   ;;  %v436_v59 = vlaneseq }
   0xd   : > { %371 = vmatprep.mubr.f32.mxu0 %v666_v0  ;;  %383 = vmatprep.mubr.f32.mxu1 %v666_v0  ;;  %s603_s23 = sshll.u32 %s786_s15, 6  ;;  %v258_v12 = vld [vmem:[%s777_s1] sm:$0xff]  ;;  %v260_v13 = vld [vmem:[%s777_s1 + $0x10] sm:$0xff]  ;;  %v263_v14 = vld [vmem:[%s778_s2 + $0x8] sm:$0xff]  ;;  %v668_v57 = vmov 1966171168  }
   0xe   : > { %640 = vset.pattern.permute.xlu0 %v667_v3  ;;  %641 = vset.pattern.permute.xlu1 %v667_v3  ;;  %s238_s26 = scalar_lea.vmem %s776_s0, %s603_s23  ;;  %v265_v15 = vld [vmem:[%s778_s2 + $0x18] sm:$0xff]  ;;  %v259_v16 = vld [vmem:[%s777_s1 + $0x8] sm:$0xff]  ;;  %s753_s19 = scalar_lea.vmem %s779_s3, %s603_s23  ;;  %v434_v58 = vunpack.c.l.s4 %v668_v57  ;;  %vm450_vm1 = vcmp.lt.s32.totalorder %v436_v59, 256 }
   0xf   : > { %276 = vperm.xlu0 %640, %v262_v1   ;;  %286 = vperm.xlu1 %641, %v264_v2   ;;  %v273_v4 = vld [vmem:[%s238_s26 + $0x38] sm:$0xff]  ;;  %v272_v5 = vld [vmem:[%s238_s26 + $0x30] sm:$0xff]  ;;  %v271_v6 = vld [vmem:[%s238_s26 + $0x28] sm:$0xff]  ;;  %v437_v1 = vshrl.u32 %v436_v59, 7  ;;  %s596_s20 = sshll.u32 %s786_s15, 1 }
  0x10   : > { %331 = vmatprep.subr.mxu0 %v273_v4  ;;  %605 = vmatprep.subr.mxu1 %v273_v4  ;;  %v270_v7 = vld [vmem:[%s238_s26 + $0x20] sm:$0xff]  ;;  %v269_v8 = vld [vmem:[%s238_s26 + $0x18] sm:$0xff]  ;;  %v268_v9 = vld [vmem:[%s238_s26 + $0x10] sm:$0xff]  ;;  %s257_s23 = scalar_lea.vmem %s780_s4, %s596_s20 }
  0x11   : > { %332 = vmatpush1.msra.mxu0 %v272_v5  ;;  %609 = vmatpush1.msra.mxu1 %v272_v5  ;;  %v267_v10 = vld [vmem:[%s238_s26 + $0x8] sm:$0xff]  ;;  %v266_v11 = vld [vmem:[%s238_s26] sm:$0xff]  ;;  %v261_v17 = vld [vmem:[%s777_s1 + $0x18] sm:$0xff] }
  0x12   : > { %333 = vmatprep.subr.mxu0 %v271_v6  ;;  %606 = vmatprep.subr.mxu1 %v271_v6 }
  0x13   : > { %334 = vmatpush1.msra.mxu0 %v270_v7  ;;  %610 = vmatpush1.msra.mxu1 %v270_v7 }
  0x14   : > { %335 = vmatprep.subr.mxu0 %v269_v8  ;;  %607 = vmatprep.subr.mxu1 %v269_v8 }
  0x15   : > { %336 = vmatpush1.msra.mxu0 %v268_v9  ;;  %611 = vmatpush1.msra.mxu1 %v268_v9 }
  0x16   : > { %337 = vmatprep.subr.mxu0 %v267_v10  ;;  %608 = vmatprep.subr.mxu1 %v267_v10 }
  0x17   : > { %338 = vmatpush1.msra.mxu0 %v266_v11  ;;  %612 = vmatpush1.msra.mxu1 %v266_v11 }
  0x18   : > { %597 = vmatmul.mubr.msk.f32.vlgmr.msra.gmra.mxu0 %vm294_vm0, %v258_v12  ;;  %599 = vmatmul.mubr.msk.f32.vlgmr.msra.gmra.mxu1 %vm294_vm0, %v260_v13 }
  0x19   : > { %377 = vmatprep.mubr.f32.mxu0 %v666_v0  ;;  %389 = vmatprep.mubr.f32.mxu1 %v666_v0  ;;  %v435_v0 = vunpack.c.0.s8 %v434_v58 }
  0x1a   : > { %281 = vperm.xlu0 %640, %v263_v14   ;;  %291 = vperm.xlu1 %641, %v265_v15  }
  0x1b   : > { %v438_v5 = vsub.s32 %v435_v0, %v437_v1 }
  0x1c   : > { %598 = vmatmul.mubr.msk.f32.gmra.mxu0 %vm294_vm0, %v259_v16  ;;  %600 = vmatmul.mubr.msk.f32.gmra.mxu1 %vm294_vm0, %v261_v17 }
  0x8a   : > { %v287_v18 = vpop.permute.xlu1 %286  ;;  %v277_v19 = vpop.permute.xlu0 %276 }
  0x95   : > { %v292_v24 = vpop.permute.xlu1 %291  ;;  %v282_v27 = vpop.permute.xlu0 %281 }
  0xd8   : > { %v373_v20 = vpop.f32.mrf.mxu0  ;;  %v385_v21 = vpop.f32.mrf.mxu1 }
  0xd9   : > { %v374_v22 = vadd.f32 %v373_v20, %v277_v19  ;;  %v386_v23 = vadd.f32 %v385_v21, %v287_v18 }
  0xda   : > { %v375_v25 = vpop.f32.mrf.mxu0  ;;  %v387_v26 = vpop.f32.mrf.mxu1 }
  0xdb   : > { %396 = vst [vmem:[%s753_s19] sm:$0xff] %v374_v22  ;;  %400 = vst [vmem:[%s753_s19 + $0x20] sm:$0xff] %v386_v23  ;;  %v376_v28 = vadd.f32 %v375_v25, %v277_v19  ;;  %v388_v29 = vadd.f32 %v387_v26, %v287_v18  ;;  %v404_v36 = vmul.f32 %v374_v22, %v374_v22 }
  0xdc   : > { %v379_v30 = vpop.f32.mrf.mxu0  ;;  %v391_v31 = vpop.f32.mrf.mxu1  ;;  %v408_v40 = vmul.f32 %v386_v23, %v386_v23 }
  0xdd   : > { %397 = vst [vmem:[%s753_s19 + $0x8] sm:$0xff] %v376_v28  ;;  %401 = vst [vmem:[%s753_s19 + $0x28] sm:$0xff] %v388_v29  ;;  %v380_v32 = vadd.f32 %v379_v30, %v282_v27  ;;  %v392_v33 = vadd.f32 %v391_v31, %v292_v24  ;;  %v405_v41 = vmul.f32 %v376_v28, %v376_v28 }
  0xde   : > { %v381_v34 = vpop.f32.mrf.mxu0  ;;  %v393_v35 = vpop.f32.mrf.mxu1  ;;  %v409_v44 = vmul.f32 %v388_v29, %v388_v29 }
  0xdf   : > { %398 = vst [vmem:[%s753_s19 + $0x10] sm:$0xff] %v380_v32  ;;  %v406_v37 = vmul.f32 %v380_v32, %v380_v32  ;;  %402 = vst [vmem:[%s753_s19 + $0x30] sm:$0xff] %v392_v33  ;;  %v382_v38 = vadd.f32 %v381_v34, %v282_v27  ;;  %v394_v39 = vadd.f32 %v393_v35, %v292_v24 }
  0xe0   : > { %v410_v45 = vmul.f32 %v392_v33, %v392_v33 }
  0xe1   : > { %v412_v42 = vadd.f32 %v406_v37, %v404_v36  ;;  %399 = vst [vmem:[%s753_s19 + $0x18] sm:$0xff] %v382_v38  ;;  %v407_v43 = vmul.f32 %v382_v38, %v382_v38  ;;  %403 = vst [vmem:[%s753_s19 + $0x38] sm:$0xff] %v394_v39  ;;  %v411_v49 = vmul.f32 %v394_v39, %v394_v39 }
  0xe3   : > { %v413_v46 = vadd.f32 %v412_v42, %v408_v40  ;;  %v421_v47 = vadd.f32 %v407_v43, %v405_v41 }
  0xe5   : > { %v414_v48 = vadd.f32 %v413_v46, %v410_v45  ;;  %v422_v50 = vadd.f32 %v421_v47, %v409_v44 }
  0xe7   : > { %v415_v51 = vrot.slane %v414_v48, 4  ;;  %v423_v52 = vadd.f32 %v422_v50, %v411_v49 }
  0xe9   : > { %v416_v53 = vadd.f32 %v415_v51, %v414_v48  ;;  %v424_v54 = vrot.slane %v423_v52, 4 }
  0xeb   : > { %v417_v55 = vrot.slane %v416_v53, 2  ;;  %v425_v56 = vadd.f32 %v424_v54, %v423_v52 }
  0xed   : > { %v418_v60 = vadd.f32 %v417_v55, %v416_v53  ;;  %v426_v61 = vrot.slane %v425_v56, 2 }
  0xef   : > { %v419_v62 = vrot.slane %v418_v60, 1  ;;  %v427_v63 = vadd.f32 %v426_v61, %v425_v56 }
  0xf1   : > { %v428_v2 = vrot.slane %v427_v63, 1  ;;  %v420_v3 = vadd.f32 %v419_v62, %v418_v60 }
  0xf3   : > { %v429_v4 = vadd.f32 %v428_v2, %v427_v63 }
  0xf5   : > { %v432_v6 = vcombine.low %v420_v3, %v429_v4 }
  0xf7   : > { %v439_v7 = vrot.slane %v432_v6, %v438_v5 }
  0xf9   : > { %v446_v8 = vrot.slane %v439_v7, %v438_v5 }
  0xfb   : > { %452 = vst.msk [vmem:[%s257_s23] sm:$0x3] %vm450_vm1, %v446_v8 }
  0xfc PF: > { %s15_s17 = sadd.s32 1, %s664_s17   ;;  %s781_s15 = smov %s660_s16 }
  0xfd   : > { %p12_p5 = scmp.ge.s32.totalorder %s15_s17, 4   ;;  %s782_s16 = smov %s784_s18 }
  0xff   :  { %14 = sbr.rel (!%p12_p5) target bundleno = 2 (0x2), region = 74 }

</bundles_post_ra>
